<compile_context>
chip_gen: v6e
topology: v6e:2x2x1
jax: 0.10.0
libtpu: 0.0.40
codegen_flags: <defaults>
</compile_context>

<pallas_src>
import jax
import jax.numpy as jnp
from jax.experimental import pallas as pl
from jax.experimental.pallas import tpu as pltpu


def _cdiv(a, b):
    return -(-a // b)


def _round_up(a, b):
    return _cdiv(a, b) * b


def _vmem_capacity_bytes():
    """Physical VMEM per TensorCore, with a conservative fallback."""
    try:
        info = pltpu.get_tpu_info()
        cap = getattr(info, "vmem_capacity_bytes", None)
        if cap:
            return int(cap)
    except Exception:
        pass
    return 64 << 20          # v7x per-TC VMEM; safe lower bound for v5e/v6e


def _needed_time_indices(dilations, rf):
    """Back-propagate which per-layer output time steps feed the final step."""
    last_idx = rf - sum(dilations) - 1          # = 0 when rf = 1 + sum(dil)
    cur = {last_idx}
    needed_out = [None] * len(dilations)
    for li in reversed(range(len(dilations))):
        needed_out[li] = sorted(cur)
        dl = dilations[li]
        cur = {i for t in cur for i in (t, t + dl)}
    return needed_out


def _choose_blocking(M, rf, cin, cout, itemsize, vmem_budget):
    """Pick (row_block, grid_m): big lane-dense blocks, minimal M padding."""
    LANE = 128
    in_row = rf * cin * itemsize                       # input-block bytes / column
    out_row = cout * 4                                 # f32 output bytes / column
    live_row = rf * cout * 4 + in_row                  # rough live intermediates
    per_row = 2 * in_row + 2 * out_row + live_row      # dbl-buffered I/O + live
    target_rows = max(LANE, (4 << 20) // max(in_row, 1))      # ~4 MiB input blocks
    budget_rows = max(LANE, vmem_budget // max(per_row, 1))
    rb = max(LANE, (min(target_rows, budget_rows) // LANE) * LANE)
    grid_m = max(1, _cdiv(M, rb))
    if grid_m == 1 and M > LANE:
        grid_m = 2                                     # let both v7x TCs work
    if grid_m > 1 and grid_m % 2:
        grid_m += 1                                    # even megacore split
    rb = _round_up(_cdiv(M, grid_m), LANE)             # minimize padding waste
    return rb, grid_m


def make_tcn_kernel(dilations, needed_out, cins):
    n_layers = len(dilations)
    # Input time slabs actually required by layer 0.
    needed_in = sorted({i for t in needed_out[0] for i in (t, t + dilations[0])})

    def kernel(x_ref, w_ref, b_ref, out_ref):
        # x_ref:   (rf, d, bm)          time-major, M = B*N on lanes
        # w_ref:   (L, 2, Cout, CImax)  stacked conv taps, (out, in) orientation
        # b_ref:   (L, Cout, 1)         f32 biases (sublane-oriented)
        # out_ref: (Cout, bm)           last-time-step features, f32
        w_all = w_ref[...]                      # tiny, resident across grid steps
        b_all = b_ref[...]

        hs = {t: x_ref[t] for t in needed_in}   # dict: time index -> (c, bm)
        for li, dl in enumerate(dilations):
            c_in = cins[li]
            w0 = w_all[li, 0, :, :c_in]         # (Cout, c_in) == W[:, :, 0, 0]
            w1 = w_all[li, 1, :, :c_in]         # (Cout, c_in) == W[:, :, 0, 1]
            b = b_all[li].astype(jnp.float32)   # (Cout, 1) -> lane broadcast
            new_hs = {}
            for t in needed_out[li]:            # only blocks that feed the output
                acc = (jnp.dot(w0, hs[t], preferred_element_type=jnp.float32)
                       + jnp.dot(w1, hs[t + dl], preferred_element_type=jnp.float32)
                       + b)
                if li == n_layers - 1:
                    out_ref[...] = acc.astype(out_ref.dtype)   # unmasked lane store
                else:
                    new_hs[t] = acc.astype(x_ref.dtype)        # MXU-friendly dtype
            hs = new_hs

    return kernel


def tcn_forward_pallas(x, params, L=4, compute_dtype=jnp.float32):
    """x: (B, T, N, d); params: list of (W (Cout,Cin,1,2), bias (Cout,)).

    compute_dtype: jnp.float32 (bit-comparable to the f32 reference) or
    jnp.bfloat16 (halves HBM traffic / VMEM on v6e/v7x; accumulation stays f32
    via preferred_element_type, bias/output stay f32).
    """
    dilations = tuple([1] + [2 ** i for i in range(L - 1)])    # (1, 1, 2, 4)
    used = params[:L]                                          # forward uses first L
    rf = 1 + sum(dilations)                                    # receptive field = 9

    B, T, N, d = x.shape
    assert T >= rf, f"need T >= receptive field {rf}, got {T}"
    M = B * N
    Cout = used[-1][0].shape[0]
    cins = tuple(W.shape[1] for (W, _) in used)                # (d, Cout, ...)
    CI = max(cins)
    itemsize = jnp.dtype(compute_dtype).itemsize

    phys_vmem = _vmem_capacity_bytes()
    row_block, grid_m = _choose_blocking(M, rf, d, Cout, itemsize, phys_vmem // 2)
    M_pad = row_block * grid_m

    # ---- glue: last rf time steps only, lane-dense (rf, d, M_pad) layout ----
    x_rf = x[:, T - rf:, :, :]                                 # (B, rf, N, d)
    xk = jnp.transpose(x_rf, (1, 3, 0, 2)).reshape(rf, d, M)   # (rf, d, M)
    xk = jnp.pad(xk, ((0, 0), (0, 0), (0, M_pad - M))).astype(compute_dtype)

    # ---- stacked weights (out, in) per tap + f32 biases ----------------------
    Ws = jnp.zeros((L, 2, Cout, CI), dtype=jnp.float32)
    Bs = jnp.zeros((L, Cout, 1), dtype=jnp.float32)
    for li, (W, b) in enumerate(used):
        cin = W.shape[1]
        Wf = jnp.asarray(W, jnp.float32)
        Ws = Ws.at[li, 0, :, :cin].set(Wf[:, :, 0, 0])
        Ws = Ws.at[li, 1, :, :cin].set(Wf[:, :, 0, 1])
        Bs = Bs.at[li, :, 0].set(jnp.asarray(b, jnp.float32))
    Ws = Ws.astype(compute_dtype)

    needed_out = _needed_time_indices(dilations, rf)

    # ---- advisory cost estimate (only the blocks actually computed) ----------
    flops = sum(len(needed_out[li]) * 2 * 2 * Cout * cins[li] * M_pad
                for li in range(L))
    bytes_accessed = (xk.size + Ws.size) * itemsize + Bs.size * 4 + M_pad * Cout * 4
    cost = pl.CostEstimate(flops=int(flops), transcendentals=0,
                           bytes_accessed=int(bytes_accessed))

    # ---- explicit VMEM limit (v5e default 16 MiB; weights counted x2) --------
    in_blk = rf * d * row_block * itemsize
    out_blk = Cout * row_block * 4
    w_bytes = Ws.size * itemsize + Bs.size * 4
    live = rf * Cout * row_block * 4 + in_blk
    need = 2 * in_blk + 2 * out_blk + 2 * w_bytes + live
    vmem_limit = int(min(int(phys_vmem * 0.9), max(32 << 20, int(need * 1.4))))

    kernel = make_tcn_kernel(dilations, needed_out, cins)
    out = pl.pallas_call(
        kernel,
        out_shape=jax.ShapeDtypeStruct((Cout, M_pad), jnp.float32),
        grid=(grid_m,),
        in_specs=[
            pl.BlockSpec((rf, d, row_block), lambda i: (0, 0, i)),
            pl.BlockSpec((L, 2, Cout, CI), lambda i: (0, 0, 0, 0)),
            pl.BlockSpec((L, Cout, 1), lambda i: (0, 0, 0)),
        ],
        out_specs=pl.BlockSpec((Cout, row_block), lambda i: (0, i)),
        compiler_params=pltpu.CompilerParams(
            dimension_semantics=("parallel",),
            vmem_limit_bytes=vmem_limit),
        cost_estimate=cost,
    )(xk, Ws, Bs)

    return out[:, :M].T.reshape(B, N, Cout)


def tcn_reference(x, params, L=4):
    """Pure-JAX reference matching the PyTorch forward exactly."""
    dilations = [1] + [2 ** i for i in range(L - 1)]
    h = jnp.transpose(x, (0, 3, 2, 1))        # x.transpose(1, 3) -> (B, d, N, T)
    for (W, b), dl in zip(params[:L], dilations):
        h = jax.lax.conv_general_dilated(
            h, W,
            window_strides=(1, 1),
            padding="VALID",
            rhs_dilation=(1, dl),
            dimension_numbers=("NCHW", "OIHW", "NCHW"),
        ) + b[None, :, None, None]
    y = h[..., -1]                            # (B, Cout, N)
    return jnp.transpose(y, (0, 2, 1))        # (B, N, Cout)


if __name__ == "__main__":
    B, T, N, d, Cout, L = 2, 16, 4, 4, 8, 4   # T > sum(dilations) so output exists

    key = jax.random.PRNGKey(0)
    key, kx = jax.random.split(key)
    x = jax.random.normal(kx, (B, T, N, d), dtype=jnp.float32)

    # Deterministic params, same shapes as nn.Conv2d(in, out, (1,2)):
    # __init__ builds L+1 = 5 layers (dilations 1,1,2,4,8); forward uses first 4.
    params = []
    cins = [d] + [Cout] * L
    for ci in cins:
        key, k1, k2 = jax.random.split(key, 3)
        bound = 1.0 / float(ci * 1 * 2) ** 0.5
        W = jax.random.uniform(k1, (Cout, ci, 1, 2), minval=-bound, maxval=bound,
                               dtype=jnp.float32)
        b = jax.random.uniform(k2, (Cout,), minval=-bound, maxval=bound,
                               dtype=jnp.float32)
        params.append((W, b))

    y_ref = tcn_reference(x, params, L=L)

    # f32 path: bit-level comparable to the f32 XLA reference.
    y = jax.block_until_ready(tcn_forward_pallas(x, params, L=L))
    assert y.shape == (B, N, Cout), y.shape
    assert bool(jnp.allclose(y, y_ref, rtol=1e-4, atol=1e-4)), "f32 mismatch vs reference"

    # bf16 inputs/weights (recommended for memory-bound v6e/v7x); f32 accumulation.
    y_bf16 = jax.block_until_ready(
        tcn_forward_pallas(x, params, L=L, compute_dtype=jnp.bfloat16))
    assert bool(jnp.allclose(y_bf16, y_ref, rtol=5e-2, atol=5e-2)), "bf16 mismatch vs reference"

    print("KERNEL_OK")
</pallas_src>

<mosaic_0001>
module attributes {stable_mosaic.version = 11 : i64} {
  func.func @kernel(%arg0: i32, %arg1: memref<9x4x128xf32, #tpu.memory_space<vmem>>, %arg2: memref<4x2x8x8xf32, #tpu.memory_space<vmem>>, %arg3: memref<4x8x1xf32, #tpu.memory_space<vmem>>, %arg4: memref<8x128xf32, #tpu.memory_space<vmem>>) attributes {dimension_semantics = [#tpu.dimension_semantics<parallel>], iteration_bounds = array<i64: 1>, scalar_prefetch = 0 : i64, scratch_operands = 0 : i64, tpu.core_type = #tpu.core_type<tc>, window_params = [{transform_indices = @transform_0, window_bounds = array<i64: 9, 4, 128>}, {pipeline_mode = #tpu.pipeline_mode<synchronous>, transform_indices = @transform_1, window_bounds = array<i64: 4, 2, 8, 8>}, {pipeline_mode = #tpu.pipeline_mode<synchronous>, transform_indices = @transform_2, window_bounds = array<i64: 4, 8, 1>}, {transform_indices = @transform_3, window_bounds = array<i64: 8, 128>}]} {
    %c0 = arith.constant 0 : index
    %c0_0 = arith.constant 0 : index
    %c0_1 = arith.constant 0 : index
    %c0_2 = arith.constant 0 : index
    %0 = vector.load %arg2[%c0, %c0_0, %c0_1, %c0_2] : memref<4x2x8x8xf32, #tpu.memory_space<vmem>>, vector<4x2x8x8xf32>
    %c0_3 = arith.constant 0 : index
    %c0_4 = arith.constant 0 : index
    %c0_5 = arith.constant 0 : index
    %1 = vector.load %arg3[%c0_3, %c0_4, %c0_5] : memref<4x8x1xf32, #tpu.memory_space<vmem>>, vector<4x8x1xf32>
    %c0_6 = arith.constant 0 : index
    %c0_7 = arith.constant 0 : index
    %c0_8 = arith.constant 0 : index
    %2 = vector.load %arg1[%c0_6, %c0_7, %c0_8] : memref<9x4x128xf32, #tpu.memory_space<vmem>>, vector<1x4x128xf32>
    %3 = vector.shape_cast %2 : vector<1x4x128xf32> to vector<4x128xf32>
    %c1 = arith.constant 1 : index
    %c0_9 = arith.constant 0 : index
    %c0_10 = arith.constant 0 : index
    %4 = vector.load %arg1[%c1, %c0_9, %c0_10] : memref<9x4x128xf32, #tpu.memory_space<vmem>>, vector<1x4x128xf32>
    %5 = vector.shape_cast %4 : vector<1x4x128xf32> to vector<4x128xf32>
    %c2 = arith.constant 2 : index
    %c0_11 = arith.constant 0 : index
    %c0_12 = arith.constant 0 : index
    %6 = vector.load %arg1[%c2, %c0_11, %c0_12] : memref<9x4x128xf32, #tpu.memory_space<vmem>>, vector<1x4x128xf32>
    %7 = vector.shape_cast %6 : vector<1x4x128xf32> to vector<4x128xf32>
    %c3 = arith.constant 3 : index
    %c0_13 = arith.constant 0 : index
    %c0_14 = arith.constant 0 : index
    %8 = vector.load %arg1[%c3, %c0_13, %c0_14] : memref<9x4x128xf32, #tpu.memory_space<vmem>>, vector<1x4x128xf32>
    %9 = vector.shape_cast %8 : vector<1x4x128xf32> to vector<4x128xf32>
    %c4 = arith.constant 4 : index
    %c0_15 = arith.constant 0 : index
    %c0_16 = arith.constant 0 : index
    %10 = vector.load %arg1[%c4, %c0_15, %c0_16] : memref<9x4x128xf32, #tpu.memory_space<vmem>>, vector<1x4x128xf32>
    %11 = vector.shape_cast %10 : vector<1x4x128xf32> to vector<4x128xf32>
    %c5 = arith.constant 5 : index
    %c0_17 = arith.constant 0 : index
    %c0_18 = arith.constant 0 : index
    %12 = vector.load %arg1[%c5, %c0_17, %c0_18] : memref<9x4x128xf32, #tpu.memory_space<vmem>>, vector<1x4x128xf32>
    %13 = vector.shape_cast %12 : vector<1x4x128xf32> to vector<4x128xf32>
    %c6 = arith.constant 6 : index
    %c0_19 = arith.constant 0 : index
    %c0_20 = arith.constant 0 : index
    %14 = vector.load %arg1[%c6, %c0_19, %c0_20] : memref<9x4x128xf32, #tpu.memory_space<vmem>>, vector<1x4x128xf32>
    %15 = vector.shape_cast %14 : vector<1x4x128xf32> to vector<4x128xf32>
    %c7 = arith.constant 7 : index
    %c0_21 = arith.constant 0 : index
    %c0_22 = arith.constant 0 : index
    %16 = vector.load %arg1[%c7, %c0_21, %c0_22] : memref<9x4x128xf32, #tpu.memory_space<vmem>>, vector<1x4x128xf32>
    %17 = vector.shape_cast %16 : vector<1x4x128xf32> to vector<4x128xf32>
    %c8 = arith.constant 8 : index
    %c0_23 = arith.constant 0 : index
    %c0_24 = arith.constant 0 : index
    %18 = vector.load %arg1[%c8, %c0_23, %c0_24] : memref<9x4x128xf32, #tpu.memory_space<vmem>>, vector<1x4x128xf32>
    %19 = vector.shape_cast %18 : vector<1x4x128xf32> to vector<4x128xf32>
    %20 = vector.extract_strided_slice %0 {offsets = [0, 0, 0, 0], sizes = [1, 1, 8, 4], strides = [1, 1, 1, 1]} : vector<4x2x8x8xf32> to vector<1x1x8x4xf32>
    %21 = vector.shape_cast %20 : vector<1x1x8x4xf32> to vector<8x4xf32>
    %22 = vector.extract_strided_slice %0 {offsets = [0, 1, 0, 0], sizes = [1, 1, 8, 4], strides = [1, 1, 1, 1]} : vector<4x2x8x8xf32> to vector<1x1x8x4xf32>
    %23 = vector.shape_cast %22 : vector<1x1x8x4xf32> to vector<8x4xf32>
    %24 = vector.extract_strided_slice %1 {offsets = [0, 0, 0], sizes = [1, 8, 1], strides = [1, 1, 1]} : vector<4x8x1xf32> to vector<1x8x1xf32>
    %25 = vector.shape_cast %24 : vector<1x8x1xf32> to vector<8x1xf32>
    %cst = arith.constant dense<0.000000e+00> : vector<8x128xf32>
    %26 = tpu.matmul %21, %3, %cst {dimension_numbers = #tpu.dot_dimension_numbers<[1], [0], [0], [1], [0, 0, 1, 1], [], []>} : vector<8x4xf32>, vector<4x128xf32>, vector<8x128xf32> -> vector<8x128xf32>
    %cst_25 = arith.constant dense<0.000000e+00> : vector<8x128xf32>
    %27 = tpu.matmul %23, %5, %cst_25 {dimension_numbers = #tpu.dot_dimension_numbers<[1], [0], [0], [1], [0, 0, 1, 1], [], []>} : vector<8x4xf32>, vector<4x128xf32>, vector<8x128xf32> -> vector<8x128xf32>
    %28 = arith.addf %26, %27 : vector<8x128xf32>
    %29 = vector.broadcast %25 : vector<8x1xf32> to vector<8x128xf32>
    %30 = arith.addf %28, %29 : vector<8x128xf32>
    %cst_26 = arith.constant dense<0.000000e+00> : vector<8x128xf32>
    %31 = tpu.matmul %21, %5, %cst_26 {dimension_numbers = #tpu.dot_dimension_numbers<[1], [0], [0], [1], [0, 0, 1, 1], [], []>} : vector<8x4xf32>, vector<4x128xf32>, vector<8x128xf32> -> vector<8x128xf32>
    %cst_27 = arith.constant dense<0.000000e+00> : vector<8x128xf32>
    %32 = tpu.matmul %23, %7, %cst_27 {dimension_numbers = #tpu.dot_dimension_numbers<[1], [0], [0], [1], [0, 0, 1, 1], [], []>} : vector<8x4xf32>, vector<4x128xf32>, vector<8x128xf32> -> vector<8x128xf32>
    %33 = arith.addf %31, %32 : vector<8x128xf32>
    %34 = vector.broadcast %25 : vector<8x1xf32> to vector<8x128xf32>
    %35 = arith.addf %33, %34 : vector<8x128xf32>
    %cst_28 = arith.constant dense<0.000000e+00> : vector<8x128xf32>
    %36 = tpu.matmul %21, %7, %cst_28 {dimension_numbers = #tpu.dot_dimension_numbers<[1], [0], [0], [1], [0, 0, 1, 1], [], []>} : vector<8x4xf32>, vector<4x128xf32>, vector<8x128xf32> -> vector<8x128xf32>
    %cst_29 = arith.constant dense<0.000000e+00> : vector<8x128xf32>
    %37 = tpu.matmul %23, %9, %cst_29 {dimension_numbers = #tpu.dot_dimension_numbers<[1], [0], [0], [1], [0, 0, 1, 1], [], []>} : vector<8x4xf32>, vector<4x128xf32>, vector<8x128xf32> -> vector<8x128xf32>
    %38 = arith.addf %36, %37 : vector<8x128xf32>
    %39 = vector.broadcast %25 : vector<8x1xf32> to vector<8x128xf32>
    %40 = arith.addf %38, %39 : vector<8x128xf32>
    %cst_30 = arith.constant dense<0.000000e+00> : vector<8x128xf32>
    %41 = tpu.matmul %21, %9, %cst_30 {dimension_numbers = #tpu.dot_dimension_numbers<[1], [0], [0], [1], [0, 0, 1, 1], [], []>} : vector<8x4xf32>, vector<4x128xf32>, vector<8x128xf32> -> vector<8x128xf32>
    %cst_31 = arith.constant dense<0.000000e+00> : vector<8x128xf32>
    %42 = tpu.matmul %23, %11, %cst_31 {dimension_numbers = #tpu.dot_dimension_numbers<[1], [0], [0], [1], [0, 0, 1, 1], [], []>} : vector<8x4xf32>, vector<4x128xf32>, vector<8x128xf32> -> vector<8x128xf32>
    %43 = arith.addf %41, %42 : vector<8x128xf32>
    %44 = vector.broadcast %25 : vector<8x1xf32> to vector<8x128xf32>
    %45 = arith.addf %43, %44 : vector<8x128xf32>
    %cst_32 = arith.constant dense<0.000000e+00> : vector<8x128xf32>
    %46 = tpu.matmul %21, %11, %cst_32 {dimension_numbers = #tpu.dot_dimension_numbers<[1], [0], [0], [1], [0, 0, 1, 1], [], []>} : vector<8x4xf32>, vector<4x128xf32>, vector<8x128xf32> -> vector<8x128xf32>
    %cst_33 = arith.constant dense<0.000000e+00> : vector<8x128xf32>
    %47 = tpu.matmul %23, %13, %cst_33 {dimension_numbers = #tpu.dot_dimension_numbers<[1], [0], [0], [1], [0, 0, 1, 1], [], []>} : vector<8x4xf32>, vector<4x128xf32>, vector<8x128xf32> -> vector<8x128xf32>
    %48 = arith.addf %46, %47 : vector<8x128xf32>
    %49 = vector.broadcast %25 : vector<8x1xf32> to vector<8x128xf32>
    %50 = arith.addf %48, %49 : vector<8x128xf32>
    %cst_34 = arith.constant dense<0.000000e+00> : vector<8x128xf32>
    %51 = tpu.matmul %21, %13, %cst_34 {dimension_numbers = #tpu.dot_dimension_numbers<[1], [0], [0], [1], [0, 0, 1, 1], [], []>} : vector<8x4xf32>, vector<4x128xf32>, vector<8x128xf32> -> vector<8x128xf32>
    %cst_35 = arith.constant dense<0.000000e+00> : vector<8x128xf32>
    %52 = tpu.matmul %23, %15, %cst_35 {dimension_numbers = #tpu.dot_dimension_numbers<[1], [0], [0], [1], [0, 0, 1, 1], [], []>} : vector<8x4xf32>, vector<4x128xf32>, vector<8x128xf32> -> vector<8x128xf32>
    %53 = arith.addf %51, %52 : vector<8x128xf32>
    %54 = vector.broadcast %25 : vector<8x1xf32> to vector<8x128xf32>
    %55 = arith.addf %53, %54 : vector<8x128xf32>
    %cst_36 = arith.constant dense<0.000000e+00> : vector<8x128xf32>
    %56 = tpu.matmul %21, %15, %cst_36 {dimension_numbers = #tpu.dot_dimension_numbers<[1], [0], [0], [1], [0, 0, 1, 1], [], []>} : vector<8x4xf32>, vector<4x128xf32>, vector<8x128xf32> -> vector<8x128xf32>
    %cst_37 = arith.constant dense<0.000000e+00> : vector<8x128xf32>
    %57 = tpu.matmul %23, %17, %cst_37 {dimension_numbers = #tpu.dot_dimension_numbers<[1], [0], [0], [1], [0, 0, 1, 1], [], []>} : vector<8x4xf32>, vector<4x128xf32>, vector<8x128xf32> -> vector<8x128xf32>
    %58 = arith.addf %56, %57 : vector<8x128xf32>
    %59 = vector.broadcast %25 : vector<8x1xf32> to vector<8x128xf32>
    %60 = arith.addf %58, %59 : vector<8x128xf32>
    %cst_38 = arith.constant dense<0.000000e+00> : vector<8x128xf32>
    %61 = tpu.matmul %21, %17, %cst_38 {dimension_numbers = #tpu.dot_dimension_numbers<[1], [0], [0], [1], [0, 0, 1, 1], [], []>} : vector<8x4xf32>, vector<4x128xf32>, vector<8x128xf32> -> vector<8x128xf32>
    %cst_39 = arith.constant dense<0.000000e+00> : vector<8x128xf32>
    %62 = tpu.matmul %23, %19, %cst_39 {dimension_numbers = #tpu.dot_dimension_numbers<[1], [0], [0], [1], [0, 0, 1, 1], [], []>} : vector<8x4xf32>, vector<4x128xf32>, vector<8x128xf32> -> vector<8x128xf32>
    %63 = arith.addf %61, %62 : vector<8x128xf32>
    %64 = vector.broadcast %25 : vector<8x1xf32> to vector<8x128xf32>
    %65 = arith.addf %63, %64 : vector<8x128xf32>
    %66 = vector.extract_strided_slice %0 {offsets = [1, 0, 0, 0], sizes = [1, 1, 8, 8], strides = [1, 1, 1, 1]} : vector<4x2x8x8xf32> to vector<1x1x8x8xf32>
    %67 = vector.shape_cast %66 : vector<1x1x8x8xf32> to vector<8x8xf32>
    %68 = vector.extract_strided_slice %0 {offsets = [1, 1, 0, 0], sizes = [1, 1, 8, 8], strides = [1, 1, 1, 1]} : vector<4x2x8x8xf32> to vector<1x1x8x8xf32>
    %69 = vector.shape_cast %68 : vector<1x1x8x8xf32> to vector<8x8xf32>
    %70 = vector.extract_strided_slice %1 {offsets = [1, 0, 0], sizes = [1, 8, 1], strides = [1, 1, 1]} : vector<4x8x1xf32> to vector<1x8x1xf32>
    %71 = vector.shape_cast %70 : vector<1x8x1xf32> to vector<8x1xf32>
    %cst_40 = arith.constant dense<0.000000e+00> : vector<8x128xf32>
    %72 = tpu.matmul %67, %30, %cst_40 {dimension_numbers = #tpu.dot_dimension_numbers<[1], [0], [0], [1], [0, 0, 1, 1], [], []>} : vector<8x8xf32>, vector<8x128xf32>, vector<8x128xf32> -> vector<8x128xf32>
    %cst_41 = arith.constant dense<0.000000e+00> : vector<8x128xf32>
    %73 = tpu.matmul %69, %35, %cst_41 {dimension_numbers = #tpu.dot_dimension_numbers<[1], [0], [0], [1], [0, 0, 1, 1], [], []>} : vector<8x8xf32>, vector<8x128xf32>, vector<8x128xf32> -> vector<8x128xf32>
    %74 = arith.addf %72, %73 : vector<8x128xf32>
    %75 = vector.broadcast %71 : vector<8x1xf32> to vector<8x128xf32>
    %76 = arith.addf %74, %75 : vector<8x128xf32>
    %cst_42 = arith.constant dense<0.000000e+00> : vector<8x128xf32>
    %77 = tpu.matmul %67, %40, %cst_42 {dimension_numbers = #tpu.dot_dimension_numbers<[1], [0], [0], [1], [0, 0, 1, 1], [], []>} : vector<8x8xf32>, vector<8x128xf32>, vector<8x128xf32> -> vector<8x128xf32>
    %cst_43 = arith.constant dense<0.000000e+00> : vector<8x128xf32>
    %78 = tpu.matmul %69, %45, %cst_43 {dimension_numbers = #tpu.dot_dimension_numbers<[1], [0], [0], [1], [0, 0, 1, 1], [], []>} : vector<8x8xf32>, vector<8x128xf32>, vector<8x128xf32> -> vector<8x128xf32>
    %79 = arith.addf %77, %78 : vector<8x128xf32>
    %80 = vector.broadcast %71 : vector<8x1xf32> to vector<8x128xf32>
    %81 = arith.addf %79, %80 : vector<8x128xf32>
    %cst_44 = arith.constant dense<0.000000e+00> : vector<8x128xf32>
    %82 = tpu.matmul %67, %50, %cst_44 {dimension_numbers = #tpu.dot_dimension_numbers<[1], [0], [0], [1], [0, 0, 1, 1], [], []>} : vector<8x8xf32>, vector<8x128xf32>, vector<8x128xf32> -> vector<8x128xf32>
    %cst_45 = arith.constant dense<0.000000e+00> : vector<8x128xf32>
    %83 = tpu.matmul %69, %55, %cst_45 {dimension_numbers = #tpu.dot_dimension_numbers<[1], [0], [0], [1], [0, 0, 1, 1], [], []>} : vector<8x8xf32>, vector<8x128xf32>, vector<8x128xf32> -> vector<8x128xf32>
    %84 = arith.addf %82, %83 : vector<8x128xf32>
    %85 = vector.broadcast %71 : vector<8x1xf32> to vector<8x128xf32>
    %86 = arith.addf %84, %85 : vector<8x128xf32>
    %cst_46 = arith.constant dense<0.000000e+00> : vector<8x128xf32>
    %87 = tpu.matmul %67, %60, %cst_46 {dimension_numbers = #tpu.dot_dimension_numbers<[1], [0], [0], [1], [0, 0, 1, 1], [], []>} : vector<8x8xf32>, vector<8x128xf32>, vector<8x128xf32> -> vector<8x128xf32>
    %cst_47 = arith.constant dense<0.000000e+00> : vector<8x128xf32>
    %88 = tpu.matmul %69, %65, %cst_47 {dimension_numbers = #tpu.dot_dimension_numbers<[1], [0], [0], [1], [0, 0, 1, 1], [], []>} : vector<8x8xf32>, vector<8x128xf32>, vector<8x128xf32> -> vector<8x128xf32>
    %89 = arith.addf %87, %88 : vector<8x128xf32>
    %90 = vector.broadcast %71 : vector<8x1xf32> to vector<8x128xf32>
    %91 = arith.addf %89, %90 : vector<8x128xf32>
    %92 = vector.extract_strided_slice %0 {offsets = [2, 0, 0, 0], sizes = [1, 1, 8, 8], strides = [1, 1, 1, 1]} : vector<4x2x8x8xf32> to vector<1x1x8x8xf32>
    %93 = vector.shape_cast %92 : vector<1x1x8x8xf32> to vector<8x8xf32>
    %94 = vector.extract_strided_slice %0 {offsets = [2, 1, 0, 0], sizes = [1, 1, 8, 8], strides = [1, 1, 1, 1]} : vector<4x2x8x8xf32> to vector<1x1x8x8xf32>
    %95 = vector.shape_cast %94 : vector<1x1x8x8xf32> to vector<8x8xf32>
    %96 = vector.extract_strided_slice %1 {offsets = [2, 0, 0], sizes = [1, 8, 1], strides = [1, 1, 1]} : vector<4x8x1xf32> to vector<1x8x1xf32>
    %97 = vector.shape_cast %96 : vector<1x8x1xf32> to vector<8x1xf32>
    %cst_48 = arith.constant dense<0.000000e+00> : vector<8x128xf32>
    %98 = tpu.matmul %93, %76, %cst_48 {dimension_numbers = #tpu.dot_dimension_numbers<[1], [0], [0], [1], [0, 0, 1, 1], [], []>} : vector<8x8xf32>, vector<8x128xf32>, vector<8x128xf32> -> vector<8x128xf32>
    %cst_49 = arith.constant dense<0.000000e+00> : vector<8x128xf32>
    %99 = tpu.matmul %95, %81, %cst_49 {dimension_numbers = #tpu.dot_dimension_numbers<[1], [0], [0], [1], [0, 0, 1, 1], [], []>} : vector<8x8xf32>, vector<8x128xf32>, vector<8x128xf32> -> vector<8x128xf32>
    %100 = arith.addf %98, %99 : vector<8x128xf32>
    %101 = vector.broadcast %97 : vector<8x1xf32> to vector<8x128xf32>
    %102 = arith.addf %100, %101 : vector<8x128xf32>
    %cst_50 = arith.constant dense<0.000000e+00> : vector<8x128xf32>
    %103 = tpu.matmul %93, %86, %cst_50 {dimension_numbers = #tpu.dot_dimension_numbers<[1], [0], [0], [1], [0, 0, 1, 1], [], []>} : vector<8x8xf32>, vector<8x128xf32>, vector<8x128xf32> -> vector<8x128xf32>
    %cst_51 = arith.constant dense<0.000000e+00> : vector<8x128xf32>
    %104 = tpu.matmul %95, %91, %cst_51 {dimension_numbers = #tpu.dot_dimension_numbers<[1], [0], [0], [1], [0, 0, 1, 1], [], []>} : vector<8x8xf32>, vector<8x128xf32>, vector<8x128xf32> -> vector<8x128xf32>
    %105 = arith.addf %103, %104 : vector<8x128xf32>
    %106 = vector.broadcast %97 : vector<8x1xf32> to vector<8x128xf32>
    %107 = arith.addf %105, %106 : vector<8x128xf32>
    %108 = vector.extract_strided_slice %0 {offsets = [3, 0, 0, 0], sizes = [1, 1, 8, 8], strides = [1, 1, 1, 1]} : vector<4x2x8x8xf32> to vector<1x1x8x8xf32>
    %109 = vector.shape_cast %108 : vector<1x1x8x8xf32> to vector<8x8xf32>
    %110 = vector.extract_strided_slice %0 {offsets = [3, 1, 0, 0], sizes = [1, 1, 8, 8], strides = [1, 1, 1, 1]} : vector<4x2x8x8xf32> to vector<1x1x8x8xf32>
    %111 = vector.shape_cast %110 : vector<1x1x8x8xf32> to vector<8x8xf32>
    %112 = vector.extract_strided_slice %1 {offsets = [3, 0, 0], sizes = [1, 8, 1], strides = [1, 1, 1]} : vector<4x8x1xf32> to vector<1x8x1xf32>
    %113 = vector.shape_cast %112 : vector<1x8x1xf32> to vector<8x1xf32>
    %cst_52 = arith.constant dense<0.000000e+00> : vector<8x128xf32>
    %114 = tpu.matmul %109, %102, %cst_52 {dimension_numbers = #tpu.dot_dimension_numbers<[1], [0], [0], [1], [0, 0, 1, 1], [], []>} : vector<8x8xf32>, vector<8x128xf32>, vector<8x128xf32> -> vector<8x128xf32>
    %cst_53 = arith.constant dense<0.000000e+00> : vector<8x128xf32>
    %115 = tpu.matmul %111, %107, %cst_53 {dimension_numbers = #tpu.dot_dimension_numbers<[1], [0], [0], [1], [0, 0, 1, 1], [], []>} : vector<8x8xf32>, vector<8x128xf32>, vector<8x128xf32> -> vector<8x128xf32>
    %116 = arith.addf %114, %115 : vector<8x128xf32>
    %117 = vector.broadcast %113 : vector<8x1xf32> to vector<8x128xf32>
    %118 = arith.addf %116, %117 : vector<8x128xf32>
    %c0_54 = arith.constant 0 : index
    %c0_55 = arith.constant 0 : index
    %119 = vector.load %arg4[%c0_54, %c0_55] : memref<8x128xf32, #tpu.memory_space<vmem>>, vector<8x128xf32>
    tpu.vector_store %arg4[%c0_54, %c0_55], %118 {strides = array<i32>} : memref<8x128xf32, #tpu.memory_space<vmem>>, vector<8x128xf32>,
    return
  }
  func.func @transform_0(%arg0: i32) -> (i32, i32, i32) {
    %c0_i32 = arith.constant 0 : i32
    %c0_i32_0 = arith.constant 0 : i32
    %c0_i32_1 = arith.constant 0 : i32
    return %c0_i32, %c0_i32_0, %arg0 : i32, i32, i32
  }
  func.func @transform_1(%arg0: i32) -> (i32, i32, i32, i32) {
    %c0_i32 = arith.constant 0 : i32
    %c0_i32_0 = arith.constant 0 : i32
    %c0_i32_1 = arith.constant 0 : i32
    %c0_i32_2 = arith.constant 0 : i32
    %c0_i32_3 = arith.constant 0 : i32
    return %c0_i32, %c0_i32_0, %c0_i32_1, %c0_i32_2 : i32, i32, i32, i32
  }
  func.func @transform_2(%arg0: i32) -> (i32, i32, i32) {
    %c0_i32 = arith.constant 0 : i32
    %c0_i32_0 = arith.constant 0 : i32
    %c0_i32_1 = arith.constant 0 : i32
    %c0_i32_2 = arith.constant 0 : i32
    return %c0_i32, %c0_i32_0, %c0_i32_1 : i32, i32, i32
  }
  func.func @transform_3(%arg0: i32) -> (i32, i32) {
    %c0_i32 = arith.constant 0 : i32
    %c0_i32_0 = arith.constant 0 : i32
    return %c0_i32, %arg0 : i32, i32
  }
}

</mosaic_0001>

<bundles_post_ra>
// kernel: tpu_custom_call.1
= control target key start
LH: loop header
LB: loop body
LE: loop exit
PB: predicated region body
PF: predicated region fallthrough
CT: control target
= control target key end

     0   :  { %8 = vsyncpa [#allocation3], 0  ;;  %s2830_s0 = inlined_call_operand.vmem [shape: f32[9,4,128], index: 0, kind: input, shape index: {}]   ;;  %s2831_s1 = inlined_call_operand.hbm [shape: f32[4,2,8,8], index: 1, kind: input, shape index: {}]   ;;  %s2832_s2 = inlined_call_operand.vmem [shape: f32[4,8,1], index: 2, kind: input, shape index: {}]   ;;  %s2833_s3 = inlined_call_operand.hbm [shape: f32[8,128], index: 3, kind: output, shape index: {}]  }
   0x1   :  { %9 = vsyncpa [#allocation4], 0  ;;  %s2580_s12 = smov [#allocation2]  }
   0x2   :  { %s17_s13 = sshll.u32 %s2580_s12, 4  ;;  %s18_s13 = int_to_ptr.vmem [resolvable:$true] %s17_s13 }
   0x3   :  { %s2544_s14 = scalar_lea.vmem %s18_s13, 1024  ;;  %p2549_p1 = scmp.lt.s32.totalorder %s18_s13, %s18_s13 }
   0x4   :  { %p2545_p0 = scmp.ne.s32.totalorder %s18_s13, %s2544_s14  ;;  %p2550_p2 = scmp.lt.s32.totalorder %s2544_s14, %s2544_s14 }
   0x6   :  { %p2551_p3 = por %p2550_p2, %p2549_p1 }
   0x8   :  { %p2552_p4 = pnand %p2551_p3, %p2545_p0 }
   0xa   :  { %2555 = shalt.err (!%p2552_p4)
}
   0xb   :  { %s2581_s15 = smov 128   ;;  %s2582_s16 = smov 8  }
   0xc   :  { %23 = dma.hbm_to_vmem [thread:$0]  %s2831_s1, 1024, %s18_s13, [#allocation3], %s2581_s15, %s2581_s15, %s2582_s16  }
   0xd   :  { %2576 = dma.done.wait [#allocation3], 1024  }
   0xe   :  { %2577 = vsyncadd [#allocation3], 4294966272  ;;  %v2583_v0 = vmov 0.0   ;;  %vm2584_vm0 = vmmov 0   ;;  %v2585_v1 = vmov 0   ;;  %vm62_vm1 = vcmask 1043456  }
   0xf   :  { %2377 = vmatprep.subr.mxu0 %v2583_v0  ;;  %2382 = vmatprep.subr.mxu1 %v2583_v0  ;;  %vm58_vm2 = vcmask 31744   ;;  %v2263_v2 = vld [vmem:[%s2830_s0 + $0x4] sm:$0xf]  ;;  %v41_v3 = vld [vmem:[%s2830_s0] sm:$0xf]  ;;  %v2622_v4 = vld [vmem:[#allocation2 + $0x8] sm:$0xff] }
  0x10   :  { %2379 = vmatprep.mubr.msk.f32.mxu0 %vm2584_vm0, %v2583_v0  ;;  %2384 = vmatprep.mubr.msk.f32.mxu1 %vm2584_vm0, %v2583_v0  ;;  %v2626_v5 = vld [vmem:[#allocation2] sm:$0xff]  ;;  %v2264_v6 = vld [vmem:[%s2830_s0 + $0x8] sm:$0xf]  ;;  %v2265_v7 = vld [vmem:[%s2830_s0 + $0xc] sm:$0xf]  ;;  %vm1226_vm3 = vcmask 64512  }
  0x11   :  { %2534 = vset.pattern.permute.xlu0 %v2585_v1  ;;  %2535 = vset.pattern.permute.xlu1 %v2585_v1  ;;  %v2266_v8 = vld [vmem:[%s2830_s0 + $0x10] sm:$0xf]  ;;  %v2267_v9 = vld [vmem:[%s2830_s0 + $0x14] sm:$0xf]  ;;  %v2268_v10 = vld [vmem:[%s2830_s0 + $0x18] sm:$0xf] }
  0x12   :  { %2378 = vmatpush3.msk.msra.mxu0 %vm62_vm1, %v2263_v2  ;;  %2383 = vmatpush3.msk.msra.mxu1 %vm62_vm1, %v41_v3  ;;  %v2269_v11 = vld [vmem:[%s2830_s0 + $0x1c] sm:$0xf]  ;;  %v2270_v12 = vld [vmem:[%s2830_s0 + $0x20] sm:$0xf]  ;;  %v38_v14 = vld [vmem:[%s2832_s2 + $0x8] sm:$0xff] }
  0x13   :  { %2380 = vmatmul.mubr.msk.f32.vlgmr.msra.gmra.mxu0 %vm58_vm2, %v2622_v4  ;;  %2385 = vmatmul.mubr.msk.f32.vlgmr.msra.gmra.mxu1 %vm58_vm2, %v2626_v5  ;;  %v37_v13 = vld [vmem:[%s2832_s2] sm:$0xff]  ;;  %v2752_v22 = vld [vmem:[#allocation2 + $0x10] sm:$0xff]  ;;  %v2758_v29 = vld [vmem:[#allocation2 + $0x18] sm:$0xff] }
  0x14   :  { %2387 = vmatprep.subr.mxu0 %v2583_v0  ;;  %2392 = vmatprep.subr.mxu1 %v2583_v0  ;;  %v39_v3 = vld [vmem:[%s2832_s2 + $0x10] sm:$0xff] }
  0x15   :  { %2388 = vmatpush3.msk.msra.mxu0 %vm62_vm1, %v2264_v6  ;;  %2389 = vmatprep.mubr.msk.f32.mxu0 %vm2584_vm0, %v2583_v0 }
  0x16   :  { %2393 = vmatpush3.msk.msra.mxu1 %vm62_vm1, %v2263_v2  ;;  %2394 = vmatprep.mubr.msk.f32.mxu1 %vm2584_vm0, %v2583_v0 }
  0x17   :  { %2390 = vmatmul.mubr.msk.f32.vlgmr.msra.gmra.mxu0 %vm58_vm2, %v2622_v4  ;;  %2395 = vmatmul.mubr.msk.f32.vlgmr.msra.gmra.mxu1 %vm58_vm2, %v2626_v5 }
  0x18   :  { %2397 = vmatprep.subr.mxu0 %v2583_v0  ;;  %2402 = vmatprep.subr.mxu1 %v2583_v0 }
  0x19   :  { %2398 = vmatpush3.msk.msra.mxu0 %vm62_vm1, %v2265_v7  ;;  %2399 = vmatprep.mubr.msk.f32.mxu0 %vm2584_vm0, %v2583_v0 }
  0x1a   :  { %2403 = vmatpush3.msk.msra.mxu1 %vm62_vm1, %v2264_v6  ;;  %2404 = vmatprep.mubr.msk.f32.mxu1 %vm2584_vm0, %v2583_v0 }
  0x1b   :  { %2400 = vmatmul.mubr.msk.f32.vlgmr.msra.gmra.mxu0 %vm58_vm2, %v2622_v4  ;;  %2405 = vmatmul.mubr.msk.f32.vlgmr.msra.gmra.mxu1 %vm58_vm2, %v2626_v5 }
  0x1c   :  { %2407 = vmatprep.subr.mxu0 %v2583_v0  ;;  %2412 = vmatprep.subr.mxu1 %v2583_v0 }
  0x1d   :  { %2408 = vmatpush3.msk.msra.mxu0 %vm62_vm1, %v2266_v8  ;;  %2409 = vmatprep.mubr.msk.f32.mxu0 %vm2584_vm0, %v2583_v0 }
  0x1e   :  { %2413 = vmatpush3.msk.msra.mxu1 %vm62_vm1, %v2265_v7  ;;  %2414 = vmatprep.mubr.msk.f32.mxu1 %vm2584_vm0, %v2583_v0 }
  0x1f   :  { %2410 = vmatmul.mubr.msk.f32.vlgmr.msra.gmra.mxu0 %vm58_vm2, %v2622_v4  ;;  %2415 = vmatmul.mubr.msk.f32.vlgmr.msra.gmra.mxu1 %vm58_vm2, %v2626_v5 }
  0x20   :  { %2417 = vmatprep.subr.mxu0 %v2583_v0  ;;  %2422 = vmatprep.subr.mxu1 %v2583_v0 }
  0x21   :  { %2418 = vmatpush3.msk.msra.mxu0 %vm62_vm1, %v2267_v9  ;;  %2419 = vmatprep.mubr.msk.f32.mxu0 %vm2584_vm0, %v2583_v0 }
  0x22   :  { %2423 = vmatpush3.msk.msra.mxu1 %vm62_vm1, %v2266_v8  ;;  %2424 = vmatprep.mubr.msk.f32.mxu1 %vm2584_vm0, %v2583_v0 }
  0x23   :  { %2420 = vmatmul.mubr.msk.f32.vlgmr.msra.gmra.mxu0 %vm58_vm2, %v2622_v4  ;;  %2425 = vmatmul.mubr.msk.f32.vlgmr.msra.gmra.mxu1 %vm58_vm2, %v2626_v5 }
  0x24   :  { %2427 = vmatprep.subr.mxu0 %v2583_v0  ;;  %2432 = vmatprep.subr.mxu1 %v2583_v0 }
  0x25   :  { %2428 = vmatpush3.msk.msra.mxu0 %vm62_vm1, %v2268_v10  ;;  %2429 = vmatprep.mubr.msk.f32.mxu0 %vm2584_vm0, %v2583_v0 }
  0x26   :  { %2433 = vmatpush3.msk.msra.mxu1 %vm62_vm1, %v2267_v9  ;;  %2434 = vmatprep.mubr.msk.f32.mxu1 %vm2584_vm0, %v2583_v0 }
  0x27   :  { %2430 = vmatmul.mubr.msk.f32.vlgmr.msra.gmra.mxu0 %vm58_vm2, %v2622_v4  ;;  %2435 = vmatmul.mubr.msk.f32.vlgmr.msra.gmra.mxu1 %vm58_vm2, %v2626_v5 }
  0x28   :  { %2437 = vmatprep.subr.mxu0 %v2583_v0  ;;  %2442 = vmatprep.subr.mxu1 %v2583_v0 }
  0x29   :  { %2438 = vmatpush3.msk.msra.mxu0 %vm62_vm1, %v2269_v11  ;;  %2439 = vmatprep.mubr.msk.f32.mxu0 %vm2584_vm0, %v2583_v0 }
  0x2a   :  { %2443 = vmatpush3.msk.msra.mxu1 %vm62_vm1, %v2268_v10  ;;  %2444 = vmatprep.mubr.msk.f32.mxu1 %vm2584_vm0, %v2583_v0 }
  0x2b   :  { %2440 = vmatmul.mubr.msk.f32.vlgmr.msra.gmra.mxu0 %vm58_vm2, %v2622_v4  ;;  %2445 = vmatmul.mubr.msk.f32.vlgmr.msra.gmra.mxu1 %vm58_vm2, %v2626_v5 }
  0x2c   :  { %2447 = vmatprep.subr.mxu0 %v2583_v0  ;;  %2452 = vmatprep.subr.mxu1 %v2583_v0 }
  0x2d   :  { %2448 = vmatpush3.msk.msra.mxu0 %vm62_vm1, %v2270_v12  ;;  %2449 = vmatprep.mubr.msk.f32.mxu0 %vm2584_vm0, %v2583_v0  ;;  %v33_v12 = vld [vmem:[#allocation2 + $0x20] sm:$0xff] }
  0x2e   :  { %2453 = vmatpush3.msk.msra.mxu1 %vm62_vm1, %v2269_v11  ;;  %2454 = vmatprep.mubr.msk.f32.mxu1 %vm2584_vm0, %v2583_v0 }
  0x2f   :  { %2450 = vmatmul.mubr.msk.f32.vlgmr.msra.gmra.mxu0 %vm58_vm2, %v2622_v4  ;;  %2455 = vmatmul.mubr.msk.f32.vlgmr.msra.gmra.mxu1 %vm58_vm2, %v2626_v5  ;;  %v40_v4 = vld [vmem:[%s2832_s2 + $0x18] sm:$0xff]  ;;  %s2586_s2 = smov [#allocation5]  }
  0x30   :  { %214 = vperm.xlu0 %2534, %v37_v13   ;;  %2462 = vmatprep.subr.mxu1 %v2583_v0  ;;  %s2254_s16 = sshll.u32 %s2586_s2, 4  ;;  %s2255_s16 = int_to_ptr.vmem [resolvable:$true] %s2254_s16 }
  0x31   :  { %2457 = vmatprep.subr.mxu0 %v2583_v0  ;;  %2459 = vmatprep.mubr.msk.f32.mxu0 %vm2584_vm0, %v2583_v0  ;;  %s2556_s17 = scalar_lea.vmem %s2255_s16, 128  ;;  %p2561_p6 = scmp.lt.s32.totalorder %s2255_s16, %s2255_s16 }
  0x32   :  { %2464 = vmatprep.mubr.msk.f32.mxu1 %vm2584_vm0, %v2583_v0  ;;  %1950 = vperm.xlu1 %2535, %v39_v3   ;;  %p2557_p5 = scmp.ne.s32.totalorder %s2255_s16, %s2556_s17  ;;  %p2562_p7 = scmp.lt.s32.totalorder %s2556_s17, %s2556_s17 }
  0x34   :  { %1375 = vperm.xlu0 %2534, %v38_v14   ;;  %p2563_p8 = por %p2562_p7, %p2561_p6 }
  0x36   :  { %2243 = vperm.xlu1 %2535, %v40_v4   ;;  %p2564_p9 = pnand %p2563_p8, %p2557_p5 }
  0xab   :  { %v2749_v15 = vpop.permute.xlu0 %214 }
  0xaf   :  { %v1376_v9 = vpop.permute.xlu0 %1375 }
  0xd3   :  { %v132_v16 = vpop.f32.mrf.mxu0  ;;  %v208_v17 = vpop.f32.mrf.mxu1 }
  0xd4   :  { %v209_v18 = vadd.f32 %v208_v17, %v132_v16 }
  0xd5   :  { %v2381_v19 = vpop.f32.mrf.mxu0  ;;  %v2386_v20 = vpop.f32.mrf.mxu1 }
  0xd6   :  { %v217_v21 = vadd.f32 %v2749_v15, %v209_v18  ;;  %v34_v19 = vld [vmem:[#allocation2 + $0x28] sm:$0xff] }
  0xd7   :  { %v287_v23 = vpop.f32.mrf.mxu0  ;;  %v357_v24 = vpop.f32.mrf.mxu1 }
  0xd8   :  { %v358_v25 = vadd.f32 %v357_v24, %v287_v23  ;;  %2463 = vmatpush3.msra.mxu1 %v217_v21 }
  0xd9   :  { %v2391_v26 = vpop.f32.mrf.mxu0  ;;  %v2396_v27 = vpop.f32.mrf.mxu1  ;;  %2465 = vmatmul.mubr.msk.f32.vlgmr.msra.gmra.mxu1 %vm1226_vm3, %v2752_v22  ;;  %2472 = vmatprep.subr.mxu1 %v2583_v0 }
  0xda   :  { %v361_v28 = vadd.f32 %v358_v25, %v2749_v15  ;;  %2474 = vmatprep.mubr.msk.f32.mxu1 %vm2584_vm0, %v2583_v0 }
  0xdb   :  { %v431_v30 = vpop.f32.mrf.mxu0  ;;  %v501_v31 = vpop.f32.mrf.mxu1 }
  0xdc   :  { %v502_v32 = vadd.f32 %v501_v31, %v431_v30  ;;  %2458 = vmatpush3.msra.mxu0 %v361_v28 }
  0xdd   :  { %v2401_v33 = vpop.f32.mrf.mxu0  ;;  %v2406_v34 = vpop.f32.mrf.mxu1  ;;  %2460 = vmatmul.mubr.msk.f32.vlgmr.msra.gmra.mxu0 %vm1226_vm3, %v2758_v29  ;;  %2467 = vmatprep.subr.mxu0 %v2583_v0 }
  0xde   :  { %v505_v35 = vadd.f32 %v502_v32, %v2749_v15  ;;  %2469 = vmatprep.mubr.msk.f32.mxu0 %vm2584_vm0, %v2583_v0 }
  0xdf   :  { %v575_v36 = vpop.f32.mrf.mxu0  ;;  %v645_v37 = vpop.f32.mrf.mxu1 }
  0xe0   :  { %v646_v38 = vadd.f32 %v645_v37, %v575_v36  ;;  %2473 = vmatpush3.msra.mxu1 %v505_v35  ;;  %v1951_v35 = vpop.permute.xlu1 %1950 }
  0xe1   :  { %v2411_v39 = vpop.f32.mrf.mxu0  ;;  %v2416_v40 = vpop.f32.mrf.mxu1  ;;  %2475 = vmatmul.mubr.msk.f32.vlgmr.msra.gmra.mxu1 %vm1226_vm3, %v2752_v22  ;;  %2482 = vmatprep.subr.mxu1 %v2583_v0 }
  0xe2   :  { %v649_v41 = vadd.f32 %v646_v38, %v2749_v15  ;;  %2484 = vmatprep.mubr.msk.f32.mxu1 %vm2584_vm0, %v2583_v0  ;;  %v35_v39 = vld [vmem:[#allocation2 + $0x30] sm:$0xff] }
  0xe3   :  { %v719_v42 = vpop.f32.mrf.mxu0  ;;  %v789_v43 = vpop.f32.mrf.mxu1 }
  0xe4   :  { %v790_v44 = vadd.f32 %v789_v43, %v719_v42  ;;  %2468 = vmatpush3.msra.mxu0 %v649_v41 }
  0xe5   :  { %v2421_v45 = vpop.f32.mrf.mxu0  ;;  %v2426_v46 = vpop.f32.mrf.mxu1  ;;  %2470 = vmatmul.mubr.msk.f32.vlgmr.msra.gmra.mxu0 %vm1226_vm3, %v2758_v29  ;;  %2477 = vmatprep.subr.mxu0 %v2583_v0 }
  0xe6   :  { %v793_v47 = vadd.f32 %v790_v44, %v2749_v15  ;;  %2479 = vmatprep.mubr.msk.f32.mxu0 %vm2584_vm0, %v2583_v0  ;;  %v36_v46 = vld [vmem:[#allocation2 + $0x38] sm:$0xff] }
  0xe7   :  { %v863_v48 = vpop.f32.mrf.mxu0  ;;  %v933_v49 = vpop.f32.mrf.mxu1 }
  0xe8   :  { %v934_v50 = vadd.f32 %v933_v49, %v863_v48  ;;  %2483 = vmatpush3.msra.mxu1 %v793_v47 }
  0xe9   :  { %v2431_v51 = vpop.f32.mrf.mxu0  ;;  %v2436_v52 = vpop.f32.mrf.mxu1  ;;  %2485 = vmatmul.mubr.msk.f32.vlgmr.msra.gmra.mxu1 %vm1226_vm3, %v2752_v22  ;;  %2492 = vmatprep.subr.mxu1 %v2583_v0 }
  0xea   :  { %v937_v53 = vadd.f32 %v934_v50, %v2749_v15  ;;  %2494 = vmatprep.mubr.msk.f32.mxu1 %vm2584_vm0, %v2583_v0  ;;  %v2244_v50 = vpop.permute.xlu1 %2243 }
  0xeb   :  { %v1007_v54 = vpop.f32.mrf.mxu0  ;;  %v1077_v55 = vpop.f32.mrf.mxu1 }
  0xec   :  { %v1078_v56 = vadd.f32 %v1077_v55, %v1007_v54  ;;  %2478 = vmatpush3.msra.mxu0 %v937_v53 }
  0xed   :  { %v2441_v57 = vpop.f32.mrf.mxu0  ;;  %v2446_v58 = vpop.f32.mrf.mxu1  ;;  %2480 = vmatmul.mubr.msk.f32.vlgmr.msra.gmra.mxu0 %vm1226_vm3, %v2758_v29  ;;  %2487 = vmatprep.subr.mxu0 %v2583_v0 }
  0xee   :  { %v1081_v59 = vadd.f32 %v1078_v56, %v2749_v15  ;;  %2489 = vmatprep.mubr.msk.f32.mxu0 %vm2584_vm0, %v2583_v0 }
  0xef   :  { %v1151_v60 = vpop.f32.mrf.mxu0  ;;  %v1221_v61 = vpop.f32.mrf.mxu1 }
  0xf0   :  { %v1222_v62 = vadd.f32 %v1221_v61, %v1151_v60  ;;  %2493 = vmatpush3.msra.mxu1 %v1081_v59 }
  0xf1   :  { %v2451_v63 = vpop.f32.mrf.mxu0  ;;  %v2456_v1 = vpop.f32.mrf.mxu1  ;;  %2495 = vmatmul.mubr.msk.f32.vlgmr.msra.gmra.mxu1 %vm1226_vm3, %v2752_v22  ;;  %2502 = vmatprep.subr.mxu1 %v2583_v0 }
  0xf2   :  { %v1225_v2 = vadd.f32 %v1222_v62, %v2749_v15  ;;  %2504 = vmatprep.mubr.msk.f32.mxu1 %vm2584_vm0, %v2583_v0 }
  0xf4   :  { %2488 = vmatpush3.msra.mxu0 %v1225_v2 }
  0xf5   :  { %2490 = vmatmul.mubr.msk.f32.vlgmr.msra.gmra.mxu0 %vm1226_vm3, %v2758_v29  ;;  %2497 = vmatprep.subr.mxu0 %v2583_v0 }
  0xf6   :  { %2499 = vmatprep.mubr.msk.f32.mxu0 %vm2584_vm0, %v2583_v0 }
 0x199   :  { %v1369_v5 = vpop.f32.mrf.mxu1 }
 0x19b   :  { %v2466_v6 = vpop.f32.mrf.mxu1 }
 0x19d   :  { %v1296_v7 = vpop.f32.mrf.mxu0 }
 0x19e   :  { %v1370_v8 = vadd.f32 %v1369_v5, %v1296_v7 }
 0x19f   :  { %v2461_v10 = vpop.f32.mrf.mxu0 }
 0x1a0   :  { %v1378_v11 = vadd.f32 %v1376_v9, %v1370_v8 }
 0x1a1   :  { %v1515_v13 = vpop.f32.mrf.mxu1 }
 0x1a2   :  { %2503 = vmatpush3.msra.mxu1 %v1378_v11 }
 0x1a3   :  { %v2476_v14 = vpop.f32.mrf.mxu1  ;;  %2512 = vmatprep.subr.mxu1 %v2583_v0  ;;  %2505 = vmatmul.mubr.msk.f32.vlgmr.msra.gmra.mxu1 %vm1226_vm3, %v33_v12 }
 0x1a4   :  { %2514 = vmatprep.mubr.msk.f32.mxu1 %vm2584_vm0, %v2583_v0 }
 0x1a5   :  { %v1445_v15 = vpop.f32.mrf.mxu0 }
 0x1a6   :  { %v1516_v16 = vadd.f32 %v1515_v13, %v1445_v15 }
 0x1a7   :  { %v2471_v17 = vpop.f32.mrf.mxu0 }
 0x1a8   :  { %v1519_v18 = vadd.f32 %v1516_v16, %v1376_v9 }
 0x1a9   :  { %v1656_v20 = vpop.f32.mrf.mxu1 }
 0x1aa   :  { %2498 = vmatpush3.msra.mxu0 %v1519_v18 }
 0x1ab   :  { %v2486_v21 = vpop.f32.mrf.mxu1  ;;  %2500 = vmatmul.mubr.msk.f32.vlgmr.msra.gmra.mxu0 %vm1226_vm3, %v34_v19  ;;  %2507 = vmatprep.subr.mxu0 %v2583_v0 }
 0x1ac   :  { %2509 = vmatprep.mubr.msk.f32.mxu0 %vm2584_vm0, %v2583_v0 }
 0x1ad   :  { %v1586_v22 = vpop.f32.mrf.mxu0 }
 0x1ae   :  { %v1657_v23 = vadd.f32 %v1656_v20, %v1586_v22 }
 0x1af   :  { %v2481_v24 = vpop.f32.mrf.mxu0 }
 0x1b0   :  { %v1660_v25 = vadd.f32 %v1657_v23, %v1376_v9 }
 0x1b1   :  { %v1797_v26 = vpop.f32.mrf.mxu1 }
 0x1b2   :  { %2513 = vmatpush3.msra.mxu1 %v1660_v25 }
 0x1b3   :  { %v2496_v27 = vpop.f32.mrf.mxu1  ;;  %2515 = vmatmul.mubr.msk.f32.vlgmr.msra.gmra.mxu1 %vm1226_vm3, %v33_v12  ;;  %2522 = vmatprep.subr.mxu1 %v2583_v0 }
 0x1b4   :  { %2524 = vmatprep.mubr.msk.f32.mxu1 %vm2584_vm0, %v2583_v0 }
 0x1b5   :  { %v1727_v28 = vpop.f32.mrf.mxu0 }
 0x1b6   :  { %v1798_v29 = vadd.f32 %v1797_v26, %v1727_v28 }
 0x1b7   :  { %v2491_v30 = vpop.f32.mrf.mxu0 }
 0x1b8   :  { %v1801_v31 = vadd.f32 %v1798_v29, %v1376_v9 }
 0x1ba   :  { %2508 = vmatpush3.msra.mxu0 %v1801_v31 }
 0x1bb   :  { %2510 = vmatmul.mubr.msk.f32.vlgmr.msra.gmra.mxu0 %vm1226_vm3, %v34_v19  ;;  %2517 = vmatprep.subr.mxu0 %v2583_v0 }
 0x1bc   :  { %2519 = vmatprep.mubr.msk.f32.mxu0 %vm2584_vm0, %v2583_v0 }
 0x263   :  { %v1944_v32 = vpop.f32.mrf.mxu1 }
 0x265   :  { %v2506_v33 = vpop.f32.mrf.mxu1 }
 0x26b   :  { %v1871_v34 = vpop.f32.mrf.mxu0 }
 0x26c   :  { %v1945_v36 = vadd.f32 %v1944_v32, %v1871_v34 }
 0x26d   :  { %v2501_v37 = vpop.f32.mrf.mxu0 }
 0x26e   :  { %v1953_v38 = vadd.f32 %v1951_v35, %v1945_v36 }
 0x270   :  { %2523 = vmatpush3.msra.mxu1 %v1953_v38 }
 0x271   :  { %2525 = vmatmul.mubr.msk.f32.vlgmr.msra.gmra.mxu1 %vm1226_vm3, %v35_v39 }
 0x273   :  { %v2090_v40 = vpop.f32.mrf.mxu1 }
 0x275   :  { %v2516_v41 = vpop.f32.mrf.mxu1 }
 0x27b   :  { %v2020_v42 = vpop.f32.mrf.mxu0 }
 0x27c   :  { %v2091_v43 = vadd.f32 %v2090_v40, %v2020_v42 }
 0x27d   :  { %v2511_v44 = vpop.f32.mrf.mxu0 }
 0x27e   :  { %v2094_v45 = vadd.f32 %v2091_v43, %v1951_v35 }
 0x280   :  { %2518 = vmatpush3.msra.mxu0 %v2094_v45 }
 0x281   :  { %2520 = vmatmul.mubr.msk.f32.vlgmr.msra.gmra.mxu0 %vm1226_vm3, %v36_v46 }
 0x331   :  { %v2237_v0 = vpop.f32.mrf.mxu1 }
 0x333   :  { %v2526_v47 = vpop.f32.mrf.mxu1 }
 0x341   :  { %v2164_v48 = vpop.f32.mrf.mxu0 }
 0x342   :  { %v2238_v49 = vadd.f32 %v2237_v0, %v2164_v48 }
 0x343   :  { %v2521_v51 = vpop.f32.mrf.mxu0 }
 0x344   :  { %v2246_v52 = vadd.f32 %v2244_v50, %v2238_v49 }
 0x346   :  { %2247 = vst [vmem:[#allocation5] sm:$0xff] %v2246_v52 }
 0x347   :  { %2567 = shalt.err (!%p2564_p9)
}
 0x348   :  { %2257 = dma.vmem_to_hbm [thread:$0]  %s2255_s16, 128, %s2833_s3, [#allocation4]  }
 0x349   :  { %2578 = dma.done.wait [#allocation4], 128  }
 0x34a   :  { %2579 = vsyncadd [#allocation4], 4294967168 }
 0x34b   :  { %2261 = vsyncpa [#allocation3], 1 }
 0x34c   :  { %2262 = vsyncpa [#allocation4], 1 }

</bundles_post_ra>
